<compile_context>
chip_gen: v7x
topology: tpu7x:2x2x1
jax: 0.10.0
libtpu: 0.0.40
codegen_flags: <defaults>
</compile_context>

<pallas_src>
import numpy as np
import jax
import jax.numpy as jnp
from jax.experimental import pallas as pl
from jax.experimental.pallas import tpu as pltpu

_LANE = 128


def _vmem_budget_and_limit():
    """Per-generation VMEM sizing (budget for live blocks, scoped limit)."""
    cap = None
    try:
        cap = getattr(pltpu.get_tpu_info(), "vmem_capacity_bytes", None)
    except Exception:  # query unavailable -> conservative numbers, safe everywhere
        cap = None
    if cap is not None and cap >= 100 * (1 << 20):   # v5e / v6e: 128 MiB physical VMEM
        return 32 * (1 << 20), 64 * (1 << 20)
    # v7x (64 MiB per TensorCore) or unknown chip: stay under the 32 MiB scoped ceiling.
    return 20 * (1 << 20), 32 * (1 << 20)


def make_positional_encoding(d_model: int, max_len: int = 5000,
                             dtype=jnp.float32) -> jnp.ndarray:
    """Replicates the PyTorch __init__ buffer. Returns (1, max_len, d_model).

    Unlike the classic snippet this also works for odd d_model (cos columns truncated).
    """
    pos = np.arange(0, max_len, dtype=np.float32)[:, None]
    div = np.exp(np.arange(0, d_model, 2, dtype=np.float32)
                 * -(np.log(10000.0) / d_model))
    pe = np.zeros((max_len, d_model), dtype=np.float32)
    pe[:, 0::2] = np.sin(pos * div)
    pe[:, 1::2] = np.cos(pos * div)[:, : d_model // 2]
    return jnp.asarray(pe[None, :, :], dtype=dtype)


def _pe_add_kernel(x_ref, pe_ref, o_ref):
    # Broadcasted elementwise add: the pe block has a size-1 leading (batch) dim.
    o_ref[...] = x_ref[...] + pe_ref[...]


def _sublane_multiple(dtype) -> int:
    # f32 -> 8, bf16 -> 16, int8/fp8 -> 32 (sub-32-bit dtypes pack along sublanes).
    return 8 * max(1, 4 // jnp.dtype(dtype).itemsize)


def _forward_seq_tiled(x: jnp.ndarray, pe: jnp.ndarray, budget: int, limit: int):
    """Path for D % 128 == 0: blocks (Bb, ts, D), grid = (S_tiles, B_tiles)."""
    B, S, D = x.shape
    itemsize = jnp.dtype(x.dtype).itemsize
    sub = _sublane_multiple(x.dtype)

    # Live VMEM: x and y blocks (Bb, ts, D) x 2 buffers each + pe (1, ts, D) x 2 buffers.
    # (pe's second buffer is dead once its block index is constant along the inner grid
    # axis, but we budget for it to stay conservative.)
    def max_ts(bb):
        return budget // ((4 * bb + 2) * D * itemsize)

    # Fold the whole batch into one block if it fits; shrink the batch tile only if even
    # a minimal sequence tile would overflow the budget.
    Bb = B
    while Bb > 1 and max_ts(Bb) < sub:
        Bb = max(1, Bb // 2)

    ts = max_ts(Bb)
    if ts >= S:
        ts = S                                    # full extent: always layout-legal
    else:
        ts = max((ts // sub) * sub, sub)          # keep the (8,128) sublane multiple

    # v7x has 2 TensorCores per chip: if the grid would collapse to a single step while
    # there is meaningful work, split the sequence so both cores get a tile.
    if ts == S and Bb == B and B * S * D * itemsize >= (2 << 20) and S >= 2 * sub:
        half = (S + 1) // 2
        ts = -(-half // sub) * sub

    grid = (pl.cdiv(S, ts), pl.cdiv(B, Bb))       # batch innermost: pe block index constant
    cost = pl.CostEstimate(flops=B * S * D, transcendentals=0,
                           bytes_accessed=(2 * B * S * D + S * D) * itemsize)

    return pl.pallas_call(
        _pe_add_kernel,
        out_shape=jax.ShapeDtypeStruct((B, S, D), x.dtype),
        grid_spec=pltpu.PrefetchScalarGridSpec(
            num_scalar_prefetch=0,
            grid=grid,
            in_specs=[
                pl.BlockSpec((Bb, ts, D), lambda s, b: (b, s, 0)),
                # Full (1, max_len, D) table: the window is selected by the block index,
                # no wrapper-side pe[:, :S] slice.  Boundary sequence tiles may DMA pe
                # rows past S; that is benign because the corresponding output rows are
                # masked on write-back -- do not "fix" this.
                pl.BlockSpec((1, ts, D), lambda s, b: (0, s, 0)),
            ],
            out_specs=pl.BlockSpec((Bb, ts, D), lambda s, b: (b, s, 0)),
        ),
        compiler_params=pltpu.CompilerParams(
            dimension_semantics=("parallel", "parallel"),
            vmem_limit_bytes=limit,
        ),
        cost_estimate=cost,
    )(x, pe)


def _forward_flat(x: jnp.ndarray, pe: jnp.ndarray, budget: int, limit: int):
    """Path for small / non-128-aligned D: flatten (S, D) into one lane-dense axis.

    x  -> (B, S*D)        blocks (Bb, tf)
    pe -> (1, max_len*D)  blocks (1, tf)   (flat pe offsets match flat x offsets)
    Reshapes are contiguous (no HBM copy); output stores are unmasked 128-wide vst.
    """
    B, S, D = x.shape
    max_len = pe.shape[1]
    itemsize = jnp.dtype(x.dtype).itemsize
    sub = _sublane_multiple(x.dtype)
    N = S * D

    x2 = x.reshape(B, N)
    pe2 = pe.reshape(1, max_len * D)

    def pad_sub(b):
        return -(-b // sub) * sub

    def fits(bb, tf):
        # x + y blocks pad bb up to a sublane multiple, pe block pads 1 -> sub;
        # everything double-buffered.
        return (4 * pad_sub(bb) + 2 * sub) * tf * itemsize <= budget

    if N <= _LANE:
        tf = N                                    # full-extent last dim is always legal
        Bb = B
        while Bb > 1 and not fits(Bb, tf):
            Bb = max(1, Bb // 2)
    else:
        # Pick the batch tile first (full batch if possible), then the widest 128-multiple
        # lane tile that fits the budget.
        Bb = B
        while Bb > 1 and not fits(Bb, _LANE):
            Bb = max(1, Bb // 2)
        tf = budget // ((4 * pad_sub(Bb) + 2 * sub) * itemsize)
        tf = max((min(tf, N) // _LANE) * _LANE, _LANE)

    grid = (pl.cdiv(N, tf), pl.cdiv(B, Bb))       # batch innermost: pe block constant
    cost = pl.CostEstimate(flops=B * N, transcendentals=0,
                           bytes_accessed=(2 * B * N + N) * itemsize)

    out2 = pl.pallas_call(
        _pe_add_kernel,
        out_shape=jax.ShapeDtypeStruct((B, N), x.dtype),
        grid_spec=pltpu.PrefetchScalarGridSpec(
            num_scalar_prefetch=0,
            grid=grid,
            in_specs=[
                pl.BlockSpec((Bb, tf), lambda n, b: (b, n)),
                # Boundary lane tiles may read pe elements past S*D (still real table
                # rows, or masked padding past max_len*D); harmless, the matching output
                # region is masked on write-back.
                pl.BlockSpec((1, tf), lambda n, b: (0, n)),
            ],
            out_specs=pl.BlockSpec((Bb, tf), lambda n, b: (b, n)),
        ),
        compiler_params=pltpu.CompilerParams(
            dimension_semantics=("parallel", "parallel"),
            vmem_limit_bytes=limit,
        ),
        cost_estimate=cost,
    )(x2, pe2)
    return out2.reshape(B, S, D)


def positional_encoding_forward(x: jnp.ndarray, pe: jnp.ndarray) -> jnp.ndarray:
    """x: (B, S, D), pe: (1, max_len, D) -> (B, S, D); y = x + pe[:, :S]."""
    B, S, D = x.shape
    if pe.ndim != 3 or pe.shape[0] != 1 or pe.shape[2] != D:
        raise ValueError(f"pe must have shape (1, max_len, {D}); got {pe.shape}")
    max_len = pe.shape[1]
    if S > max_len:
        raise ValueError(f"sequence length {S} exceeds positional table max_len {max_len}")
    if pe.dtype != x.dtype:
        # NOTE: PyTorch keeps the buffer in float32 and lets promotion decide the result
        # dtype; casting pe down (e.g. to bf16) changes rounding by ~1e-3 relative in the
        # table values but halves its DMA bytes and keeps tiling layouts consistent.
        pe = pe.astype(x.dtype)

    budget, limit = _vmem_budget_and_limit()
    sub = _sublane_multiple(x.dtype)
    if D % _LANE == 0 and S >= sub:
        return _forward_seq_tiled(x, pe, budget, limit)
    return _forward_flat(x, pe, budget, limit)


if __name__ == "__main__":
    key = jax.random.PRNGKey(0)

    # Demo-sized case matching the module defaults (d_model=32 -> flattened lane-dense path).
    B, S, D, max_len = 2, 8, 32, 64
    x = jax.random.normal(key, (B, S, D), dtype=jnp.float32)
    pe = make_positional_encoding(D, max_len)
    y = jax.block_until_ready(positional_encoding_forward(x, pe))
    np.testing.assert_allclose(np.asarray(y), np.asarray(x + pe[:, :S, :]),
                               rtol=1e-6, atol=1e-6)

    # 128-aligned d_model -> sequence-tiled (batch folded into block) path.
    B2, S2, D2, max_len2 = 2, 16, 128, 32
    x2 = jax.random.normal(jax.random.PRNGKey(0), (B2, S2, D2), dtype=jnp.float32)
    pe2 = make_positional_encoding(D2, max_len2)
    y2 = jax.block_until_ready(positional_encoding_forward(x2, pe2))
    np.testing.assert_allclose(np.asarray(y2), np.asarray(x2 + pe2[:, :S2, :]),
                               rtol=1e-6, atol=1e-6)

    print("KERNEL_OK")
</pallas_src>

<mosaic_0001>
module attributes {stable_mosaic.version = 11 : i64} {
  func.func @_pe_add_kernel(%arg0: i32, %arg1: i32, %arg2: memref<2x256xf32, #tpu.memory_space<vmem>>, %arg3: memref<1x256xf32, #tpu.memory_space<vmem>>, %arg4: memref<2x256xf32, #tpu.memory_space<vmem>>) attributes {dimension_semantics = [#tpu.dimension_semantics<parallel>, #tpu.dimension_semantics<parallel>], iteration_bounds = array<i64: 1, 1>, scalar_prefetch = 0 : i64, scratch_operands = 0 : i64, tpu.core_type = #tpu.core_type<tc>, window_params = [{transform_indices = @transform_0, window_bounds = array<i64: 2, 256>}, {transform_indices = @transform_1, window_bounds = array<i64: 1, 256>}, {transform_indices = @transform_2, window_bounds = array<i64: 2, 256>}]} {
    %c0 = arith.constant 0 : index
    %c0_0 = arith.constant 0 : index
    %0 = vector.load %arg2[%c0, %c0_0] : memref<2x256xf32, #tpu.memory_space<vmem>>, vector<2x256xf32>
    %c0_1 = arith.constant 0 : index
    %c0_2 = arith.constant 0 : index
    %1 = vector.load %arg3[%c0_1, %c0_2] : memref<1x256xf32, #tpu.memory_space<vmem>>, vector<1x256xf32>
    %2 = vector.broadcast %1 : vector<1x256xf32> to vector<2x256xf32>
    %3 = arith.addf %0, %2 : vector<2x256xf32>
    %c0_3 = arith.constant 0 : index
    %c0_4 = arith.constant 0 : index
    %4 = vector.load %arg4[%c0_3, %c0_4] : memref<2x256xf32, #tpu.memory_space<vmem>>, vector<2x256xf32>
    tpu.vector_store %arg4[%c0_3, %c0_4], %3 {strides = array<i32>} : memref<2x256xf32, #tpu.memory_space<vmem>>, vector<2x256xf32>,
    return
  }
  func.func @transform_0(%arg0: i32, %arg1: i32) -> (i32, i32) {
    %c0_i32 = arith.constant 0 : i32
    return %arg1, %arg0 : i32, i32
  }
  func.func @transform_1(%arg0: i32, %arg1: i32) -> (i32, i32) {
    %c0_i32 = arith.constant 0 : i32
    %c0_i32_0 = arith.constant 0 : i32
    return %c0_i32, %arg0 : i32, i32
  }
  func.func @transform_2(%arg0: i32, %arg1: i32) -> (i32, i32) {
    %c0_i32 = arith.constant 0 : i32
    return %arg1, %arg0 : i32, i32
  }
}

</mosaic_0001>

<bundles_post_ra>
// kernel: tpu_custom_call.1
= control target key start
LH: loop header
LB: loop body
LE: loop exit
PB: predicated region body
PF: predicated region fallthrough
CT: control target
= control target key end

     0   :  { %7 = vsyncpa [#allocation3], 0  ;;  %s215_s0 = inlined_call_operand.hbm [shape: f32[2,256], index: 0, kind: input, shape index: {}]   ;;  %s216_s1 = inlined_call_operand.hbm [shape: f32[1,2048], index: 1, kind: input, shape index: {}]   ;;  %s217_s2 = inlined_call_operand.hbm [shape: f32[2,256], index: 2, kind: output, shape index: {}]  }
   0x1   :  { %8 = vsyncpa [#allocation6], 0 }
   0x2   :  { %9 = vsyncpa [#allocation4], 0  ;;  %s150_s9 = smov [#allocation2]   ;;  %s151_s11 = smov [#allocation5]  }
   0x3   :  { %s16_s10 = sshll.u32 %s150_s9, 4  ;;  %s26_s12 = sshll.u32 %s151_s11, 4  ;;  %s17_s10 = int_to_ptr.vmem [resolvable:$true] %s16_s10  ;;  %s169_s12 = int_to_ptr.vmem [resolvable:$true] %s26_s12 }
   0x4   :  { %s78_s15 = scalar_lea.hbm %s215_s0, 64 }
   0x5   :  { %p79_p0 = scmp.ne.s32.totalorder %s215_s0, %s78_s15  ;;  %p82_p1 = scmp.lt.u32.totalorder %s78_s15, %s215_s0 }
   0x7   :  { %p84_p2 = pnand %p82_p1, %p79_p0 }
   0x9   :  { %87 = shalt.err (!%p84_p2)
}
   0xa   :  { %s88_s20 = scalar_lea.vmem %s17_s10, 64  ;;  %p93_p4 = scmp.lt.s32.totalorder %s17_s10, %s17_s10 }
   0xb   :  { %p89_p3 = scmp.ne.s32.totalorder %s17_s10, %s88_s20  ;;  %p94_p5 = scmp.lt.s32.totalorder %s88_s20, %s88_s20 }
   0xd   :  { %p95_p6 = por %p94_p5, %p93_p4 }
   0xf   :  { %p96_p7 = pnand %p95_p6, %p89_p3 }
  0x11   :  { %99 = shalt.err (!%p96_p7)
}
  0x12   :  { %19 = dma.hbm_to_vmem [thread:$0]  %s215_s0, 64, %s17_s10, [#allocation3]  }
  0x13   :  { %s100_s25 = scalar_lea.hbm %s216_s1, 32  ;;  %s102_s30 = scalar_lea.hbm %s216_s1, 256 }
  0x14   :  { %p101_p8 = scmp.ne.s32.totalorder %s216_s1, %s100_s25  ;;  %p103_p9 = scmp.lt.u32.totalorder %s102_s30, %s100_s25 }
  0x15   :  { %p104_p10 = scmp.lt.u32.totalorder %s100_s25, %s216_s1 }
  0x17   :  { %p105_p11 = por %p104_p10, %p103_p9 }
  0x19   :  { %p106_p12 = pnand %p105_p11, %p101_p8 }
  0x1b   :  { %109 = shalt.err (!%p106_p12)
}
  0x1c   :  { %s110_s0 = scalar_lea.vmem %s169_s12, 32  ;;  %p115_p0 = scmp.lt.s32.totalorder %s169_s12, %s169_s12 }
  0x1d   :  { %p111_p13 = scmp.ne.s32.totalorder %s169_s12, %s110_s0  ;;  %p116_p1 = scmp.lt.s32.totalorder %s110_s0, %s110_s0 }
  0x1f   :  { %p117_p2 = por %p116_p1, %p115_p0 }
  0x21   :  { %p118_p3 = pnand %p117_p2, %p111_p13 }
  0x23   :  { %121 = shalt.err (!%p118_p3)
}
  0x24   :  { %29 = dma.hbm_to_vmem [thread:$0]  %s216_s1, 32, %s169_s12, [#allocation6]  }
  0x25   :  { %144 = dma.done.wait [#allocation3], 64  }
  0x26   :  { %145 = vsyncadd [#allocation3], 4294967232 }
  0x27   :  { %146 = dma.done.wait [#allocation6], 32  }
  0x28   :  { %147 = vsyncadd [#allocation6], 4294967264  ;;  %v39_v0 = vlaneseq  ;;  %v152_v1 = vmov 1983009808   ;;  %v37_v7 = vld [vmem:[#allocation5] sm:$0x3] }
  0x29   :  { %v49_v2 = vunpack.c.l.s4 %v152_v1  ;;  %v36_v12 = vld [vmem:[#allocation2] sm:$0xf]  ;;  %s153_s7 = smov [#allocation7]  }
  0x2a   :  { %v40_v3 = vshrl.u32 %v39_v0, 7  ;;  %s64_s8 = sshll.u32 %s153_s7, 4  ;;  %s65_s8 = int_to_ptr.vmem [resolvable:$true] %s64_s8 }
  0x2b   :  { %v50_v6 = vunpack.c.0.s8 %v49_v2  ;;  %s122_s1 = scalar_lea.vmem %s65_s8, 64  ;;  %p127_p5 = scmp.lt.s32.totalorder %s65_s8, %s65_s8 }
  0x2c   :  { %v41_v4 = vsub.s32 0, %v40_v3  ;;  %v45_v5 = vsub.s32 1, %v40_v3  ;;  %p123_p4 = scmp.ne.s32.totalorder %s65_s8, %s122_s1  ;;  %p128_p6 = scmp.lt.s32.totalorder %s122_s1, %s122_s1 }
  0x2d   :  { %v53_v10 = vsub.s32 %v50_v6, %v40_v3 }
  0x2e   :  { %v42_v8 = vrot.slane %v37_v7, %v41_v4  ;;  %v46_v9 = vrot.slane %v37_v7, %v45_v5  ;;  %p129_p7 = por %p128_p6, %p127_p5 }
  0x30   :  { %v47_v11 = vcombine.low %v42_v8, %v46_v9  ;;  %p130_p8 = pnand %p129_p7, %p123_p4 }
  0x32   :  { %v54_v13 = vrot.slane %v47_v11, %v53_v10 }
  0x34   :  { %v56_v14 = vadd.f32 %v54_v13, %v36_v12 }
  0x36   :  { %57 = vst [vmem:[#allocation7] sm:$0xf] %v56_v14 }
  0x37   :  { %133 = shalt.err (!%p130_p8)
}
  0x38   :  { %s134_s11 = scalar_lea.hbm %s217_s2, 64 }
  0x39   :  { %p135_p9 = scmp.ne.s32.totalorder %s217_s2, %s134_s11  ;;  %p138_p10 = scmp.lt.u32.totalorder %s134_s11, %s217_s2 }
  0x3b   :  { %p140_p11 = pnand %p138_p10, %p135_p9 }
  0x3d   :  { %143 = shalt.err (!%p140_p11)
}
  0x3e   :  { %67 = dma.vmem_to_hbm [thread:$0]  %s65_s8, 64, %s217_s2, [#allocation4]  }
  0x3f   :  { %148 = dma.done.wait [#allocation4], 64  }
  0x40   :  { %149 = vsyncadd [#allocation4], 4294967232 }
  0x41   :  { %71 = vsyncpa [#allocation3], 1 }
  0x42   :  { %72 = vsyncpa [#allocation6], 1 }
  0x43   :  { %73 = vsyncpa [#allocation4], 1 }

</bundles_post_ra>
